<compile_context>
chip_gen: v7x
topology: tpu7x:2x2x1
jax: 0.10.0
libtpu: 0.0.40
codegen_flags: <defaults>
</compile_context>

<pallas_src>
import functools
from typing import NamedTuple

import jax
import jax.numpy as jnp
from jax.experimental import pallas as pl
from jax.experimental.pallas import tpu as pltpu

LANES = 128          # TPU lane width; hidden dims are zero-padded up to this.
H1, H2 = 64, 32      # real hidden widths of the DQN MLP


def _leaky_relu(x, slope=0.01):
    return jnp.where(x > 0, x, slope * x)


def _round_up(v, m):
    return ((v + m - 1) // m) * m


class SlabOffsets(NamedTuple):
    w1: int
    b1: int
    w2: int
    b2: int
    w3: int
    b3: int
    total: int


def _offsets(n_in):
    """Row offsets (8-aligned) of each parameter inside the packed slab."""
    w1 = 0
    b1 = _round_up(w1 + n_in, 8)
    w2 = _round_up(b1 + 1, 8)
    b2 = _round_up(w2 + LANES, 8)     # W2 stored as a full (128, 128) block
    w3 = _round_up(b2 + 1, 8)
    b3 = _round_up(w3 + LANES, 8)     # W3 stored as a full (128, 128) block
    total = _round_up(b3 + 1, 8)
    return SlabOffsets(w1, b1, w2, b2, w3, b3, total)


def pack_params(w1, b1, w2, b2, w3, b3):
    """Pack all parameters into one (total_rows, 128) f32 slab (built once).

    Weights are (in, out); biases are (out,). Unused rows/lanes are zero, so
    the padded lanes propagate exact zeros through matmul + bias + leaky-ReLU.
    """
    n_in = w1.shape[0]
    n_actions = w3.shape[1]
    offs = _offsets(n_in)
    slab = jnp.zeros((offs.total, LANES), jnp.float32)
    slab = slab.at[offs.w1:offs.w1 + n_in, :H1].set(w1.astype(jnp.float32))
    slab = slab.at[offs.b1, :H1].set(b1.reshape(-1).astype(jnp.float32))
    slab = slab.at[offs.w2:offs.w2 + H1, :H2].set(w2.astype(jnp.float32))
    slab = slab.at[offs.b2, :H2].set(b2.reshape(-1).astype(jnp.float32))
    slab = slab.at[offs.w3:offs.w3 + H2, :n_actions].set(w3.astype(jnp.float32))
    slab = slab.at[offs.b3, :n_actions].set(b3.reshape(-1).astype(jnp.float32))
    return slab


def dqn_kernel(x_ref, p_ref, o_ref, *, n_in, offs):
    """Fused 3-layer MLP on one batch tile; all params come from one VMEM slab."""
    x = x_ref[...]                                     # (TB, n_in)

    # Static ref-view slices of the packed parameter slab (read once).
    w1 = p_ref[offs.w1:offs.w1 + n_in, :]              # (n_in, 128)
    b1 = p_ref[offs.b1:offs.b1 + 1, :]                 # (1, 128)
    w2 = p_ref[offs.w2:offs.w2 + LANES, :]             # (128, 128)
    b2 = p_ref[offs.b2:offs.b2 + 1, :]
    w3 = p_ref[offs.w3:offs.w3 + LANES, :]             # (128, 128)
    b3 = p_ref[offs.b3:offs.b3 + 1, :]

    h1 = _leaky_relu(jnp.dot(x, w1, preferred_element_type=jnp.float32) + b1)
    h2 = _leaky_relu(jnp.dot(h1, w2, preferred_element_type=jnp.float32) + b2)
    out = jnp.dot(h2, w3, preferred_element_type=jnp.float32) + b3

    # Lane-dense (TB, 128) store; real Q-values live in the first n_actions lanes.
    o_ref[...] = out.astype(o_ref.dtype)


@functools.partial(jax.jit, static_argnames=("n_inputs", "n_actions", "block_b"))
def dqn_forward(x, params_slab, *, n_inputs, n_actions, block_b=512):
    """Run the fused DQN forward pass.

    Small batches (B <= block_b): single grid step, whole batch in VMEM, no
    padding or batch slicing. Large batches: 1-D 'parallel' grid over 512-row
    tiles (double-buffered x/out pipelining, sharded across TCs on v7x).
    """
    batch = x.shape[0]
    offs = _offsets(n_inputs)
    assert params_slab.shape == (offs.total, LANES)

    tb = batch if batch <= block_b else block_b
    grid = (pl.cdiv(batch, tb),)

    kernel = functools.partial(dqn_kernel, n_in=n_inputs, offs=offs)

    out_padded = pl.pallas_call(
        kernel,
        out_shape=jax.ShapeDtypeStruct((batch, LANES), jnp.float32),
        grid_spec=pltpu.PrefetchScalarGridSpec(
            num_scalar_prefetch=0,
            grid=grid,
            in_specs=[
                pl.BlockSpec((tb, n_inputs), lambda i: (i, 0)),        # x tile
                pl.BlockSpec((offs.total, LANES), lambda i: (0, 0)),   # weights (grid-invariant)
            ],
            out_specs=pl.BlockSpec((tb, LANES), lambda i: (i, 0)),
        ),
        compiler_params=pltpu.CompilerParams(
            dimension_semantics=("parallel",),
        ),
    )(x, params_slab)

    return out_padded[:, :n_actions]


def init_dqn_params(key, n_inputs, n_actions):
    """PyTorch-style Linear init: U(-1/sqrt(fan_in), +1/sqrt(fan_in))."""
    dims = [(n_inputs, H1), (H1, H2), (H2, n_actions)]
    params = []
    keys = jax.random.split(key, 2 * len(dims))
    for i, (fan_in, fan_out) in enumerate(dims):
        bound = 1.0 / float(fan_in) ** 0.5
        w = jax.random.uniform(keys[2 * i], (fan_in, fan_out), jnp.float32, -bound, bound)
        b = jax.random.uniform(keys[2 * i + 1], (fan_out,), jnp.float32, -bound, bound)
        params += [w, b]
    return tuple(params)


def dqn_reference(x, w1, b1, w2, b2, w3, b3):
    h1 = _leaky_relu(x @ w1 + b1)
    h2 = _leaky_relu(h1 @ w2 + b2)
    return h2 @ w3 + b3


if __name__ == "__main__":
    # Inverted pendulum: observation dim 4, two discrete actions.
    n_inputs, n_actions, batch = 4, 2, 2

    key = jax.random.PRNGKey(0)
    pkey, xkey, xkey2 = jax.random.split(key, 3)
    w1, b1, w2, b2, w3, b3 = init_dqn_params(pkey, n_inputs, n_actions)
    params_slab = pack_params(w1, b1, w2, b2, w3, b3)   # built once, reused

    # Small (acting) batch — single-step grid, no padding round trips.
    x = jax.random.normal(xkey, (batch, n_inputs), dtype=jnp.float32)
    out = jax.block_until_ready(
        dqn_forward(x, params_slab, n_inputs=n_inputs, n_actions=n_actions)
    )
    ref = dqn_reference(x, w1, b1, w2, b2, w3, b3)
    assert out.shape == (batch, n_actions)
    assert jnp.allclose(out, ref, atol=1e-5, rtol=1e-5)

    # Replay-buffer-sized batch — exercises the 'parallel' batch grid path.
    xb = jax.random.normal(xkey2, (1024, n_inputs), dtype=jnp.float32)
    outb = jax.block_until_ready(
        dqn_forward(xb, params_slab, n_inputs=n_inputs, n_actions=n_actions)
    )
    refb = dqn_reference(xb, w1, b1, w2, b2, w3, b3)
    assert outb.shape == (1024, n_actions)
    assert jnp.allclose(outb, refb, atol=1e-4, rtol=1e-4)

    print("KERNEL_OK")
</pallas_src>

<mosaic_0001>
module attributes {stable_mosaic.version = 11 : i64} {
  func.func @dqn_kernel(%arg0: i32, %arg1: memref<2x4xf32, #tpu.memory_space<vmem>>, %arg2: memref<288x128xf32, #tpu.memory_space<vmem>>, %arg3: memref<2x128xf32, #tpu.memory_space<vmem>>) attributes {dimension_semantics = [#tpu.dimension_semantics<parallel>], iteration_bounds = array<i64: 1>, scalar_prefetch = 0 : i64, scratch_operands = 0 : i64, tpu.core_type = #tpu.core_type<tc>, window_params = [{transform_indices = @transform_0, window_bounds = array<i64: 2, 4>}, {pipeline_mode = #tpu.pipeline_mode<synchronous>, transform_indices = @transform_1, window_bounds = array<i64: 288, 128>}, {transform_indices = @transform_2, window_bounds = array<i64: 2, 128>}]} {
    %c0 = arith.constant 0 : index
    %c0_0 = arith.constant 0 : index
    %0 = vector.load %arg1[%c0, %c0_0] : memref<2x4xf32, #tpu.memory_space<vmem>>, vector<2x4xf32>
    %c0_1 = arith.constant 0 : index
    %c0_2 = arith.constant 0 : index
    %1 = vector.load %arg2[%c0_1, %c0_2] : memref<288x128xf32, #tpu.memory_space<vmem>>, vector<4x128xf32>
    %c8 = arith.constant 8 : index
    %c0_3 = arith.constant 0 : index
    %2 = vector.load %arg2[%c8, %c0_3] : memref<288x128xf32, #tpu.memory_space<vmem>>, vector<1x128xf32>
    %c16 = arith.constant 16 : index
    %c0_4 = arith.constant 0 : index
    %3 = vector.load %arg2[%c16, %c0_4] : memref<288x128xf32, #tpu.memory_space<vmem>>, vector<128x128xf32>
    %c144 = arith.constant 144 : index
    %c0_5 = arith.constant 0 : index
    %4 = vector.load %arg2[%c144, %c0_5] : memref<288x128xf32, #tpu.memory_space<vmem>>, vector<1x128xf32>
    %c152 = arith.constant 152 : index
    %c0_6 = arith.constant 0 : index
    %5 = vector.load %arg2[%c152, %c0_6] : memref<288x128xf32, #tpu.memory_space<vmem>>, vector<128x128xf32>
    %c280 = arith.constant 280 : index
    %c0_7 = arith.constant 0 : index
    %6 = vector.load %arg2[%c280, %c0_7] : memref<288x128xf32, #tpu.memory_space<vmem>>, vector<1x128xf32>
    %cst = arith.constant dense<0.000000e+00> : vector<2x128xf32>
    %7 = tpu.matmul %0, %1, %cst {dimension_numbers = #tpu.dot_dimension_numbers<[1], [0], [0], [1], [0, 0, 1, 1], [], []>} : vector<2x4xf32>, vector<4x128xf32>, vector<2x128xf32> -> vector<2x128xf32>
    %8 = vector.broadcast %2 : vector<1x128xf32> to vector<2x128xf32>
    %9 = arith.addf %7, %8 : vector<2x128xf32>
    %cst_8 = arith.constant 0.000000e+00 : f32
    %10 = vector.broadcast %cst_8 : f32 to vector<2x128xf32>
    %11 = arith.cmpf ogt, %9, %10 : vector<2x128xf32>
    %cst_9 = arith.constant 0.00999999977 : f32
    %12 = vector.broadcast %cst_9 : f32 to vector<2x128xf32>
    %13 = arith.mulf %12, %9 : vector<2x128xf32>
    %14 = arith.select %11, %9, %13 : vector<2x128xi1>, vector<2x128xf32>
    %cst_10 = arith.constant dense<0.000000e+00> : vector<2x128xf32>
    %15 = tpu.matmul %14, %3, %cst_10 {dimension_numbers = #tpu.dot_dimension_numbers<[1], [0], [0], [1], [0, 0, 1, 1], [], []>} : vector<2x128xf32>, vector<128x128xf32>, vector<2x128xf32> -> vector<2x128xf32>
    %16 = vector.broadcast %4 : vector<1x128xf32> to vector<2x128xf32>
    %17 = arith.addf %15, %16 : vector<2x128xf32>
    %cst_11 = arith.constant 0.000000e+00 : f32
    %18 = vector.broadcast %cst_11 : f32 to vector<2x128xf32>
    %19 = arith.cmpf ogt, %17, %18 : vector<2x128xf32>
    %cst_12 = arith.constant 0.00999999977 : f32
    %20 = vector.broadcast %cst_12 : f32 to vector<2x128xf32>
    %21 = arith.mulf %20, %17 : vector<2x128xf32>
    %22 = arith.select %19, %17, %21 : vector<2x128xi1>, vector<2x128xf32>
    %cst_13 = arith.constant dense<0.000000e+00> : vector<2x128xf32>
    %23 = tpu.matmul %22, %5, %cst_13 {dimension_numbers = #tpu.dot_dimension_numbers<[1], [0], [0], [1], [0, 0, 1, 1], [], []>} : vector<2x128xf32>, vector<128x128xf32>, vector<2x128xf32> -> vector<2x128xf32>
    %24 = vector.broadcast %6 : vector<1x128xf32> to vector<2x128xf32>
    %25 = arith.addf %23, %24 : vector<2x128xf32>
    %c0_14 = arith.constant 0 : index
    %c0_15 = arith.constant 0 : index
    %26 = vector.load %arg3[%c0_14, %c0_15] : memref<2x128xf32, #tpu.memory_space<vmem>>, vector<2x128xf32>
    tpu.vector_store %arg3[%c0_14, %c0_15], %25 {strides = array<i32>} : memref<2x128xf32, #tpu.memory_space<vmem>>, vector<2x128xf32>,
    return
  }
  func.func @transform_0(%arg0: i32) -> (i32, i32) {
    %c0_i32 = arith.constant 0 : i32
    %c0_i32_0 = arith.constant 0 : i32
    return %arg0, %c0_i32 : i32, i32
  }
  func.func @transform_1(%arg0: i32) -> (i32, i32) {
    %c0_i32 = arith.constant 0 : i32
    %c0_i32_0 = arith.constant 0 : i32
    %c0_i32_1 = arith.constant 0 : i32
    return %c0_i32, %c0_i32_0 : i32, i32
  }
  func.func @transform_2(%arg0: i32) -> (i32, i32) {
    %c0_i32 = arith.constant 0 : i32
    %c0_i32_0 = arith.constant 0 : i32
    return %arg0, %c0_i32 : i32, i32
  }
}

</mosaic_0001>

<bundles_post_ra>
// kernel: dqn_forward.1
= control target key start
LH: loop header
LB: loop body
LE: loop exit
PB: predicated region body
PF: predicated region fallthrough
CT: control target
= control target key end

     0   :  { %7 = vsyncpa [#allocation3], 0  ;;  %s657_s0 = inlined_call_operand.hbm [shape: f32[2,4], index: 0, kind: input, shape index: {}]   ;;  %s658_s1 = inlined_call_operand.hbm [shape: f32[288,128], index: 1, kind: input, shape index: {}]   ;;  %s659_s2 = inlined_call_operand.hbm [shape: f32[2,128], index: 2, kind: output, shape index: {}]  }
   0x1   :  { %8 = vsyncpa [#allocation6], 0 }
   0x2   :  { %9 = vsyncpa [#allocation4], 0  ;;  %s572_s9 = smov [#allocation2]   ;;  %s573_s11 = smov [#allocation5]  }
   0x3   :  { %s16_s10 = sshll.u32 %s572_s9, 4  ;;  %s25_s12 = sshll.u32 %s573_s11, 4  ;;  %s17_s10 = int_to_ptr.vmem [resolvable:$true] %s16_s10  ;;  %s595_s12 = int_to_ptr.vmem [resolvable:$true] %s25_s12 }
   0x4   :  { %s500_s15 = scalar_lea.hbm %s657_s0, 32 }
   0x5   :  { %p501_p0 = scmp.ne.s32.totalorder %s657_s0, %s500_s15  ;;  %p504_p1 = scmp.lt.u32.totalorder %s500_s15, %s657_s0 }
   0x7   :  { %p506_p2 = pnand %p504_p1, %p501_p0 }
   0x9   :  { %509 = shalt.err (!%p506_p2)
}
   0xa   :  { %s510_s20 = scalar_lea.vmem %s17_s10, 32  ;;  %p515_p4 = scmp.lt.s32.totalorder %s17_s10, %s17_s10 }
   0xb   :  { %p511_p3 = scmp.ne.s32.totalorder %s17_s10, %s510_s20  ;;  %p516_p5 = scmp.lt.s32.totalorder %s510_s20, %s510_s20 }
   0xd   :  { %p517_p6 = por %p516_p5, %p515_p4 }
   0xf   :  { %p518_p7 = pnand %p517_p6, %p511_p3 }
  0x11   :  { %521 = shalt.err (!%p518_p7)
}
  0x12   :  { %19 = dma.hbm_to_vmem [thread:$0]  %s657_s0, 32, %s17_s10, [#allocation3]  }
  0x13   :  { %s522_s25 = scalar_lea.hbm %s658_s1, 4608 }
  0x14   :  { %p523_p8 = scmp.ne.s32.totalorder %s658_s1, %s522_s25  ;;  %p526_p9 = scmp.lt.u32.totalorder %s522_s25, %s658_s1 }
  0x16   :  { %p528_p10 = pnand %p526_p9, %p523_p8 }
  0x18   :  { %531 = shalt.err (!%p528_p10)
}
  0x19   :  { %s532_s30 = scalar_lea.vmem %s595_s12, 4608  ;;  %p537_p12 = scmp.lt.s32.totalorder %s595_s12, %s595_s12 }
  0x1a   :  { %p533_p11 = scmp.ne.s32.totalorder %s595_s12, %s532_s30  ;;  %p538_p13 = scmp.lt.s32.totalorder %s532_s30, %s532_s30 }
  0x1c   :  { %p539_p0 = por %p538_p13, %p537_p12 }
  0x1e   :  { %p540_p1 = pnand %p539_p0, %p533_p11 }
  0x20   :  { %543 = shalt.err (!%p540_p1)
}
  0x21   :  { %s574_s0 = smov 128   ;;  %s575_s3 = smov 8  }
  0x22   :  { %31 = dma.hbm_to_vmem [thread:$0]  %s658_s1, 4608, %s595_s12, [#allocation6], %s574_s0, %s574_s0, %s575_s3  }
  0x23   :  { %566 = dma.done.wait [#allocation3], 32  }
  0x24   :  { %567 = vsyncadd [#allocation3], 4294967264 }
  0x25   :  { %568 = dma.done.wait [#allocation6], 4608  }
  0x26   :  { %569 = vsyncadd [#allocation6], 4294962688  ;;  %v576_v0 = vmov 0.0   ;;  %vm577_vm0 = vmmov 0   ;;  %v578_v1 = vmov 0.0|0.0   ;;  %vm83_vm1 = vcmask 1043456  }
  0x27   :  { %369 = vmatprep.subr.mxu0 %v576_v0  ;;  %371 = vmatprep.mubr.msk.f32.mxu0 %vm577_vm0, %v576_v0  ;;  %vm79_vm2 = vcmask 31744   ;;  %v39_v2 = vld [vmem:[#allocation5] sm:$0xf]  ;;  %v38_v3 = vld [vmem:[#allocation2] sm:$0x3]  ;;  %v41_v4 = vld [vmem:[#allocation5 + $0x10] sm:$0xff] }
  0x28   :  { %444 = vmatprep.subr.bf16.mxu1 %v578_v1  ;;  %406 = vmatprep.mubr.msk.f32.mxu1 %vm577_vm0, %v576_v0  ;;  %v42_v5 = vld [vmem:[#allocation5 + $0x18] sm:$0xff]  ;;  %v43_v6 = vld [vmem:[#allocation5 + $0x20] sm:$0xff]  ;;  %v44_v7 = vld [vmem:[#allocation5 + $0x28] sm:$0xff]  ;;  %s579_s1 = smov [#allocation7]  }
  0x29   :  { %370 = vmatpush3.msk.msra.mxu0 %vm83_vm1, %v39_v2  ;;  %v445_v8 = vpack.c.bf16 %v42_v5, %v41_v4  ;;  %v448_v9 = vpack.c.bf16 %v44_v7, %v43_v6  ;;  %v45_v10 = vld [vmem:[#allocation5 + $0x30] sm:$0xff]  ;;  %v46_v11 = vld [vmem:[#allocation5 + $0x38] sm:$0xff]  ;;  %v47_v13 = vld [vmem:[#allocation5 + $0x40] sm:$0xff]  ;;  %s318_s6 = sshll.u32 %s579_s1, 4  ;;  %s319_s6 = int_to_ptr.vmem [resolvable:$true] %s318_s6 }
  0x2a   :  { %372 = vmatmul.mubr.msk.f32.vlgmr.msra.gmra.mrb[0].mxu0 %vm79_vm2, %v38_v3  ;;  %468 = vmatprep.subr.bf16.mxu0 %v578_v1  ;;  %v451_v12 = vpack.c.bf16 %v46_v11, %v45_v10  ;;  %v48_v14 = vld [vmem:[#allocation5 + $0x48] sm:$0xff]  ;;  %v49_v16 = vld [vmem:[#allocation5 + $0x50] sm:$0xff]  ;;  %v50_v17 = vld [vmem:[#allocation5 + $0x58] sm:$0xff]  ;;  %s544_s7 = scalar_lea.vmem %s319_s6, 32  ;;  %p549_p3 = scmp.lt.s32.totalorder %s319_s6, %s319_s6 }
  0x2b   :  { %441 = vmatprep.mubr.msk.f32.mxu0 %vm577_vm0, %v576_v0  ;;  %446 = vmatpush3.bf16.msra.mxu1 %v445_v8  ;;  %v454_v15 = vpack.c.bf16 %v48_v14, %v47_v13  ;;  %v457_v18 = vpack.c.bf16 %v50_v17, %v49_v16  ;;  %v51_v19 = vld [vmem:[#allocation5 + $0x60] sm:$0xff]  ;;  %v52_v20 = vld [vmem:[#allocation5 + $0x68] sm:$0xff]  ;;  %v53_v22 = vld [vmem:[#allocation5 + $0x70] sm:$0xff]  ;;  %p545_p2 = scmp.ne.s32.totalorder %s319_s6, %s544_s7  ;;  %p550_p4 = scmp.lt.s32.totalorder %s544_s7, %s544_s7 }
  0x2c   :  { %447 = vmatprep.subr.bf16.mxu1 %v578_v1  ;;  %v460_v21 = vpack.c.bf16 %v52_v20, %v51_v19  ;;  %v54_v23 = vld [vmem:[#allocation5 + $0x78] sm:$0xff]  ;;  %v55_v25 = vld [vmem:[#allocation5 + $0x80] sm:$0xff]  ;;  %v56_v26 = vld [vmem:[#allocation5 + $0x88] sm:$0xff] }
  0x2d   :  { %v463_v24 = vpack.c.bf16 %v54_v23, %v53_v22  ;;  %v466_v27 = vpack.c.bf16 %v56_v26, %v55_v25  ;;  %v58_v28 = vld [vmem:[#allocation5 + $0x98] sm:$0xff]  ;;  %v59_v29 = vld [vmem:[#allocation5 + $0xa0] sm:$0xff]  ;;  %v60_v30 = vld [vmem:[#allocation5 + $0xa8] sm:$0xff]  ;;  %p551_p5 = por %p550_p4, %p549_p3 }
  0x2e   :  { %v469_v31 = vpack.c.bf16 %v59_v29, %v58_v28  ;;  %v61_v32 = vld [vmem:[#allocation5 + $0xb0] sm:$0xff]  ;;  %v62_v34 = vld [vmem:[#allocation5 + $0xb8] sm:$0xff]  ;;  %v63_v35 = vld [vmem:[#allocation5 + $0xc0] sm:$0xff] }
  0x2f   :  { %449 = vmatpush3.bf16.msra.mxu1 %v448_v9  ;;  %v472_v33 = vpack.c.bf16 %v61_v32, %v60_v30  ;;  %v475_v36 = vpack.c.bf16 %v63_v35, %v62_v34  ;;  %v64_v37 = vld [vmem:[#allocation5 + $0xc8] sm:$0xff]  ;;  %v65_v38 = vld [vmem:[#allocation5 + $0xd0] sm:$0xff]  ;;  %v66_v40 = vld [vmem:[#allocation5 + $0xd8] sm:$0xff]  ;;  %p552_p6 = pnand %p551_p5, %p545_p2 }
  0x30   :  { %450 = vmatprep.subr.bf16.mxu1 %v578_v1  ;;  %470 = vmatpush3.bf16.msra.mxu0 %v469_v31  ;;  %v478_v39 = vpack.c.bf16 %v65_v38, %v64_v37  ;;  %v67_v41 = vld [vmem:[#allocation5 + $0xe0] sm:$0xff]  ;;  %v68_v43 = vld [vmem:[#allocation5 + $0xe8] sm:$0xff]  ;;  %v69_v44 = vld [vmem:[#allocation5 + $0xf0] sm:$0xff] }
  0x31   :  { %471 = vmatprep.subr.bf16.mxu0 %v578_v1  ;;  %v481_v42 = vpack.c.bf16 %v67_v41, %v66_v40  ;;  %v484_v45 = vpack.c.bf16 %v69_v44, %v68_v43  ;;  %v70_v46 = vld [vmem:[#allocation5 + $0xf8] sm:$0xff]  ;;  %v71_v47 = vld [vmem:[#allocation5 + $0x100] sm:$0xff]  ;;  %v328_v49 = vld [vmem:[#allocation5 + $0x8] ss:$0 sm:$0xff] }
  0x32   :  { %v487_v48 = vpack.c.bf16 %v71_v47, %v70_v46  ;;  %v72_v55 = vld [vmem:[#allocation5 + $0x108] sm:$0xff]  ;;  %v73_v56 = vld [vmem:[#allocation5 + $0x110] sm:$0xff]  ;;  %v332_v0 = vld [vmem:[#allocation5 + $0x118] ss:$0 sm:$0xff] }
  0x33   :  { %452 = vmatpush3.bf16.msra.mxu1 %v451_v12  ;;  %v490_v57 = vpack.c.bf16 %v73_v56, %v72_v55  ;;  %v331_v58 = vld [vmem:[#allocation5 + $0x90] ss:$0 sm:$0xff] }
  0x34   :  { %453 = vmatprep.subr.bf16.mxu1 %v578_v1  ;;  %473 = vmatpush3.bf16.msra.mxu0 %v472_v33 }
  0x35   :  { %474 = vmatprep.subr.bf16.mxu0 %v578_v1 }
  0x37   :  { %455 = vmatpush3.bf16.msra.mxu1 %v454_v15 }
  0x38   :  { %456 = vmatprep.subr.bf16.mxu1 %v578_v1  ;;  %476 = vmatpush3.bf16.msra.mxu0 %v475_v36 }
  0x39   :  { %477 = vmatprep.subr.bf16.mxu0 %v578_v1 }
  0x3b   :  { %458 = vmatpush3.bf16.msra.mxu1 %v457_v18 }
  0x3c   :  { %459 = vmatprep.subr.bf16.mxu1 %v578_v1  ;;  %479 = vmatpush3.bf16.msra.mxu0 %v478_v39 }
  0x3d   :  { %480 = vmatprep.subr.bf16.mxu0 %v578_v1 }
  0x3f   :  { %461 = vmatpush3.bf16.msra.mxu1 %v460_v21 }
  0x40   :  { %462 = vmatprep.subr.bf16.mxu1 %v578_v1  ;;  %482 = vmatpush3.bf16.msra.mxu0 %v481_v42 }
  0x41   :  { %483 = vmatprep.subr.bf16.mxu0 %v578_v1 }
  0x43   :  { %464 = vmatpush3.bf16.msra.mxu1 %v463_v24 }
  0x44   :  { %465 = vmatprep.subr.bf16.mxu1 %v578_v1  ;;  %485 = vmatpush3.bf16.msra.mxu0 %v484_v45 }
  0x45   :  { %486 = vmatprep.subr.bf16.mxu0 %v578_v1 }
  0x47   :  { %467 = vmatpush3.bf16.msra.mxu1 %v466_v27 }
  0x48   :  { %488 = vmatpush3.bf16.msra.mxu0 %v487_v48 }
  0x49   :  { %489 = vmatprep.subr.bf16.mxu0 %v578_v1 }
  0x4c   :  { %491 = vmatpush3.bf16.msra.mxu0 %v490_v57 }
  0xfd   :  { %v153_v50 = vpop.f32.mrb[0].mxu0 }
  0xfe   :  { %v154_v51 = vadd.f32 %v328_v49, %v153_v50  ;;  %v373_v52 = vpop.f32.mrb[1].mxu0 }
 0x100   :  { %v158_v53 = vmul.f32 0.01, %v154_v51  ;;  %vm157_vm3 = vcmp.gt.f32.partialorder %v154_v51, 0.0 }
 0x102   :  { %v159_v54 = vsel %vm157_vm3, %v154_v51, %v158_v53 }
 0x103   :  { %407 = vmatmul.mubr.f32.vlgmr.msra.gmra.mrb[0].mxu1 %v159_v54 }
 0x1d6   :  { %v230_v59 = vpop.f32.mrb[0].mxu1 }
 0x1d7   :  { %v231_v60 = vadd.f32 %v331_v58, %v230_v59  ;;  %v408_v61 = vpop.f32.mrb[1].mxu1 }
 0x1d9   :  { %vm234_vm4 = vcmp.gt.f32.partialorder %v231_v60, 0.0  ;;  %v235_v62 = vmul.f32 0.01, %v231_v60 }
 0x1db   :  { %v236_v63 = vsel %vm234_vm4, %v231_v60, %v235_v62 }
 0x1dc   :  { %442 = vmatmul.mubr.f32.vlgmr.msra.gmra.mrb[2].mxu0 %v236_v63 }
 0x2af   :  { %v307_v1 = vpop.f32.mrb[2].mxu0 }
 0x2b0   :  { %v308_v2 = vadd.f32 %v332_v0, %v307_v1  ;;  %v443_v3 = vpop.f32.mrb[3].mxu0 }
 0x2b2   :  { %311 = vst [vmem:[#allocation7] sm:$0x3] %v308_v2 }
 0x2b3   :  { %555 = shalt.err (!%p552_p6)
}
 0x2b4   :  { %s556_s10 = scalar_lea.hbm %s659_s2, 32 }
 0x2b5   :  { %p557_p7 = scmp.ne.s32.totalorder %s659_s2, %s556_s10  ;;  %p560_p8 = scmp.lt.u32.totalorder %s556_s10, %s659_s2 }
 0x2b7   :  { %p562_p9 = pnand %p560_p8, %p557_p7 }
 0x2b9   :  { %565 = shalt.err (!%p562_p9)
}
 0x2ba   :  { %321 = dma.vmem_to_hbm [thread:$0]  %s319_s6, 32, %s659_s2, [#allocation4]  }
 0x2bb   :  { %570 = dma.done.wait [#allocation4], 32  }
 0x2bc   :  { %571 = vsyncadd [#allocation4], 4294967264 }
 0x2bd   :  { %325 = vsyncpa [#allocation3], 1 }
 0x2be   :  { %326 = vsyncpa [#allocation6], 1 }
 0x2bf   :  { %327 = vsyncpa [#allocation4], 1 }

</bundles_post_ra>
